<compile_context>
chip_gen: v6e
topology: v6e:2x2x1
jax: 0.10.0
libtpu: 0.0.40
codegen_flags: <defaults>
</compile_context>

<pallas_src>
import math

import numpy as np
import jax
import jax.numpy as jnp
from jax.experimental import pallas as pl
from jax.experimental.pallas import tpu as pltpu


def _householder_kernel(c_ref, z_ref, o_ref):
    # c_ref: (4, c_blk, 1) rows = [sin(t/2), cos(t/2), 2*sin(t/2), 2*cos(t/2)]
    #        in the compute dtype, broadcast over the lane axis.
    # z_ref / o_ref: (tb, 2, c_blk, t) in the activation dtype.
    sin_h = c_ref[0]
    cos_h = c_ref[1]
    two_sin_h = c_ref[2]
    two_cos_h = c_ref[3]
    cdt = sin_h.dtype

    x = z_ref[:, 0].astype(cdt)                  # (tb, c_blk, t)
    y = z_ref[:, 1].astype(cdt)

    # Householder reflection across the hyperplane with normal
    # (sin(t/2), -cos(t/2)), applied only on the positive side (ReLU gate).
    # Algebraically identical to the rotation form of the PyTorch module.
    r = jnp.maximum(x * sin_h - y * cos_h, 0)
    o_ref[:, 0] = (x - two_sin_h * r).astype(o_ref.dtype)
    o_ref[:, 1] = (y + two_cos_h * r).astype(o_ref.dtype)


_BLOCK_BUDGET = 2 << 20  # ~2 MiB per z block: double-buffered in+out ~ 8 MiB,
                         # under the v5e 16 MiB scoped-VMEM default and well
                         # inside v6e (32 MiB default) / v7x (64 MiB VMEM).


def _pick_tiles(n, subl, lanes, itemsize, pack):
    """Returns (batch tile, channel-half tile, lane tile)."""
    col_bytes = 2 * subl * itemsize            # bytes per lane column per image
    img_bytes = col_bytes * lanes              # one image's z block at full HW

    if img_bytes <= _BLOCK_BUDGET:
        # Whole image per block; grow the batch tile to amortize the ~0.35 us
        # per-grid-step overhead for small images.
        t, c_blk = lanes, subl
        tb = max(1, min(n, _BLOCK_BUDGET // max(1, img_bytes)))
        while n % tb:                          # keep the leading grid dim exact
            tb -= 1
    elif col_bytes * 512 <= _BLOCK_BUDGET:
        # Full channel-half axis, budget-limited lane-dense tile (>= 512 lanes,
        # no "must divide" constraint: Pallas masks the ragged tail block).
        tb, c_blk = 1, subl
        t = (_BLOCK_BUDGET // col_bytes) // 128 * 128
    else:
        # Very large C: tile the channel-half axis too so blocks stay inside
        # budget on every TPU generation.
        tb = 1
        t = min(lanes, 512)
        c_blk = max(pack, (_BLOCK_BUDGET // (2 * itemsize * t)) // pack * pack)
        c_blk = min(c_blk, subl)

    # v7x has two TensorCores per chip: if the parallel grid collapsed to a
    # single step but there is real work, split the lane axis so both cores
    # (megacore sharding on other parts) get a share.
    if (n // tb) * pl.cdiv(subl, c_blk) * pl.cdiv(lanes, t) == 1:
        if n * img_bytes >= (1 << 20) and lanes >= 256:
            t = ((pl.cdiv(lanes, 2) + 127) // 128) * 128
    return tb, c_blk, t


def householder(z_nchw: jax.Array, theta: jax.Array, *, compute_dtype=None) -> jax.Array:
    """HouseHolder activation.  z_nchw: (N, C, H, W), theta: (C//2,)."""
    N, C, H, W = z_nchw.shape
    assert C % 2 == 0
    c_half = C // 2
    HW = H * W
    dtype = z_nchw.dtype
    itemsize = jnp.dtype(dtype).itemsize
    pack = max(8, 32 // itemsize)              # sublanes per vreg for this dtype

    if compute_dtype is None:
        compute_dtype = jnp.float32
        if dtype == jnp.bfloat16:
            # bf16 VALU exists on v6e / v7x (keeps the kernel HBM-bound there);
            # v5e has no bf16 ALU, so keep the f32 upcast path on v5e.
            try:
                kind = jax.devices()[0].device_kind.lower()
                if not ("v5 lite" in kind or "v5e" in kind):
                    compute_dtype = jnp.bfloat16
            except Exception:
                pass

    # Fold spatial chunks into the sublane axis when c_half alone would leave
    # vregs mostly empty (free reshape; constants are repeated to match).
    k = 1
    if c_half % pack != 0:
        k0 = pack // math.gcd(c_half, pack)
        if HW % k0 == 0 and HW // k0 >= 128:
            k = k0
    subl = c_half * k
    lanes = HW // k

    # Free reshape of contiguous NCHW: (N, C, H, W) -> (N, 2, subl, lanes).
    z_r = z_nchw.reshape(N, 2, subl, lanes)

    # Hoisted trig in float32 (matches the float32 parameter), packed into a
    # single per-channel constant array.
    th = theta.astype(jnp.float32).reshape(c_half)
    sin_h = jnp.sin(0.5 * th)
    cos_h = jnp.cos(0.5 * th)
    consts = jnp.stack([sin_h, cos_h, 2.0 * sin_h, 2.0 * cos_h], axis=0)
    if k > 1:
        consts = jnp.repeat(consts, k, axis=1)       # row r -> channel r // k
    consts = consts.astype(compute_dtype).reshape(4, subl, 1)

    tb, c_blk, t = _pick_tiles(N, subl, lanes, itemsize, pack)

    grid = (N // tb, pl.cdiv(subl, c_blk), pl.cdiv(lanes, t))
    const_spec = pl.BlockSpec((4, c_blk, 1), lambda b, c, l: (0, c, 0))
    z_spec = pl.BlockSpec((tb, 2, c_blk, t), lambda b, c, l: (b, 0, c, l))

    out = pl.pallas_call(
        _householder_kernel,
        out_shape=jax.ShapeDtypeStruct((N, 2, subl, lanes), dtype),
        grid_spec=pltpu.PrefetchScalarGridSpec(
            num_scalar_prefetch=0,
            grid=grid,
            in_specs=[const_spec, z_spec],
            out_specs=z_spec,
        ),
        compiler_params=pltpu.CompilerParams(
            dimension_semantics=("parallel", "parallel", "parallel"),
        ),
    )(consts, z_r)

    return out.reshape(N, C, H, W)


def _householder_ref(z, theta):
    # Pure-JAX reference mirroring the PyTorch forward exactly.
    c_half = z.shape[1] // 2
    th = theta.reshape((1, -1) + (1,) * (z.ndim - 2))
    x, y = z[:, :c_half], z[:, c_half:]
    selector = x * jnp.sin(0.5 * th) - y * jnp.cos(0.5 * th)
    a_2 = x * jnp.cos(th) + y * jnp.sin(th)
    b_2 = x * jnp.sin(th) - y * jnp.cos(th)
    a = x * (selector <= 0) + a_2 * (selector > 0)
    b = y * (selector <= 0) + b_2 * (selector > 0)
    return jnp.concatenate([a, b], axis=1)


if __name__ == "__main__":
    key = jax.random.PRNGKey(0)

    # Primary case: NCHW = (2, 4, 16, 16), default theta init (0.5 * pi).
    N, C, H, W = 2, 4, 16, 16
    z = jax.random.normal(key, (N, C, H, W), dtype=jnp.float32)
    theta = jnp.full((C // 2,), 0.5 * np.pi, dtype=jnp.float32)
    out = jax.block_until_ready(householder(z, theta))
    ref = _householder_ref(z, theta)
    assert out.shape == (N, C, H, W)
    assert jnp.allclose(out, ref, atol=1e-5, rtol=1e-5)

    # Secondary case exercising the sublane-folding path (c_half=2, HW=1024)
    # and a non-trivial theta.
    z2 = jax.random.normal(jax.random.PRNGKey(1), (2, 4, 32, 32), dtype=jnp.float32)
    theta2 = jax.random.normal(jax.random.PRNGKey(2), (2,), dtype=jnp.float32)
    out2 = jax.block_until_ready(householder(z2, theta2))
    ref2 = _householder_ref(z2, theta2)
    assert jnp.allclose(out2, ref2, atol=1e-5, rtol=1e-5)

    print("KERNEL_OK")
</pallas_src>

<mosaic_0001>
module attributes {stable_mosaic.version = 11 : i64} {
  func.func @_householder_kernel(%arg0: i32, %arg1: i32, %arg2: i32, %arg3: memref<4x2x1xf32, #tpu.memory_space<vmem>>, %arg4: memref<2x2x2x256xf32, #tpu.memory_space<vmem>>, %arg5: memref<2x2x2x256xf32, #tpu.memory_space<vmem>>) attributes {dimension_semantics = [#tpu.dimension_semantics<parallel>, #tpu.dimension_semantics<parallel>, #tpu.dimension_semantics<parallel>], iteration_bounds = array<i64: 1, 1, 1>, scalar_prefetch = 0 : i64, scratch_operands = 0 : i64, tpu.core_type = #tpu.core_type<tc>, window_params = [{transform_indices = @transform_0, window_bounds = array<i64: 4, 2, 1>}, {transform_indices = @transform_1, window_bounds = array<i64: 2, 2, 2, 256>}, {transform_indices = @transform_2, window_bounds = array<i64: 2, 2, 2, 256>}]} {
    %c0 = arith.constant 0 : index
    %c0_0 = arith.constant 0 : index
    %c0_1 = arith.constant 0 : index
    %0 = vector.load %arg3[%c0, %c0_0, %c0_1] : memref<4x2x1xf32, #tpu.memory_space<vmem>>, vector<1x2x1xf32>
    %1 = vector.shape_cast %0 : vector<1x2x1xf32> to vector<2x1xf32>
    %c1 = arith.constant 1 : index
    %c0_2 = arith.constant 0 : index
    %c0_3 = arith.constant 0 : index
    %2 = vector.load %arg3[%c1, %c0_2, %c0_3] : memref<4x2x1xf32, #tpu.memory_space<vmem>>, vector<1x2x1xf32>
    %3 = vector.shape_cast %2 : vector<1x2x1xf32> to vector<2x1xf32>
    %c2 = arith.constant 2 : index
    %c0_4 = arith.constant 0 : index
    %c0_5 = arith.constant 0 : index
    %4 = vector.load %arg3[%c2, %c0_4, %c0_5] : memref<4x2x1xf32, #tpu.memory_space<vmem>>, vector<1x2x1xf32>
    %5 = vector.shape_cast %4 : vector<1x2x1xf32> to vector<2x1xf32>
    %c3 = arith.constant 3 : index
    %c0_6 = arith.constant 0 : index
    %c0_7 = arith.constant 0 : index
    %6 = vector.load %arg3[%c3, %c0_6, %c0_7] : memref<4x2x1xf32, #tpu.memory_space<vmem>>, vector<1x2x1xf32>
    %7 = vector.shape_cast %6 : vector<1x2x1xf32> to vector<2x1xf32>
    %c0_8 = arith.constant 0 : index
    %c0_9 = arith.constant 0 : index
    %c0_10 = arith.constant 0 : index
    %c0_11 = arith.constant 0 : index
    %8 = vector.load %arg4[%c0_8, %c0_9, %c0_10, %c0_11] : memref<2x2x2x256xf32, #tpu.memory_space<vmem>>, vector<2x1x2x256xf32>
    %9 = vector.shape_cast %8 : vector<2x1x2x256xf32> to vector<2x2x256xf32>
    %c0_12 = arith.constant 0 : index
    %c1_13 = arith.constant 1 : index
    %c0_14 = arith.constant 0 : index
    %c0_15 = arith.constant 0 : index
    %10 = vector.load %arg4[%c0_12, %c1_13, %c0_14, %c0_15] : memref<2x2x2x256xf32, #tpu.memory_space<vmem>>, vector<2x1x2x256xf32>
    %11 = vector.shape_cast %10 : vector<2x1x2x256xf32> to vector<2x2x256xf32>
    %12 = vector.shape_cast %1 : vector<2x1xf32> to vector<1x2x1xf32>
    %13 = vector.broadcast %12 : vector<1x2x1xf32> to vector<2x2x256xf32>
    %14 = arith.mulf %9, %13 : vector<2x2x256xf32>
    %15 = vector.shape_cast %3 : vector<2x1xf32> to vector<1x2x1xf32>
    %16 = vector.broadcast %15 : vector<1x2x1xf32> to vector<2x2x256xf32>
    %17 = arith.mulf %11, %16 : vector<2x2x256xf32>
    %18 = arith.subf %14, %17 : vector<2x2x256xf32>
    %cst = arith.constant 0.000000e+00 : f32
    %19 = vector.broadcast %cst : f32 to vector<2x2x256xf32>
    %20 = arith.maximumf %18, %19 : vector<2x2x256xf32>
    %21 = vector.shape_cast %5 : vector<2x1xf32> to vector<1x2x1xf32>
    %22 = vector.broadcast %21 : vector<1x2x1xf32> to vector<2x2x256xf32>
    %23 = arith.mulf %22, %20 : vector<2x2x256xf32>
    %24 = arith.subf %9, %23 : vector<2x2x256xf32>
    %c0_16 = arith.constant 0 : index
    %c0_17 = arith.constant 0 : index
    %c0_18 = arith.constant 0 : index
    %c0_19 = arith.constant 0 : index
    %25 = vector.load %arg5[%c0_16, %c0_17, %c0_18, %c0_19] : memref<2x2x2x256xf32, #tpu.memory_space<vmem>>, vector<2x1x2x256xf32>
    %26 = vector.shape_cast %25 : vector<2x1x2x256xf32> to vector<2x2x256xf32>
    %27 = vector.shape_cast %24 : vector<2x2x256xf32> to vector<2x1x2x256xf32>
    tpu.vector_store %arg5[%c0_16, %c0_17, %c0_18, %c0_19], %27 {strides = array<i32>} : memref<2x2x2x256xf32, #tpu.memory_space<vmem>>, vector<2x1x2x256xf32>,
    %28 = vector.shape_cast %7 : vector<2x1xf32> to vector<1x2x1xf32>
    %29 = vector.broadcast %28 : vector<1x2x1xf32> to vector<2x2x256xf32>
    %30 = arith.mulf %29, %20 : vector<2x2x256xf32>
    %31 = arith.addf %11, %30 : vector<2x2x256xf32>
    %c0_20 = arith.constant 0 : index
    %c1_21 = arith.constant 1 : index
    %c0_22 = arith.constant 0 : index
    %c0_23 = arith.constant 0 : index
    %32 = vector.load %arg5[%c0_20, %c1_21, %c0_22, %c0_23] : memref<2x2x2x256xf32, #tpu.memory_space<vmem>>, vector<2x1x2x256xf32>
    %33 = vector.shape_cast %32 : vector<2x1x2x256xf32> to vector<2x2x256xf32>
    %34 = vector.shape_cast %31 : vector<2x2x256xf32> to vector<2x1x2x256xf32>
    tpu.vector_store %arg5[%c0_20, %c1_21, %c0_22, %c0_23], %34 {strides = array<i32>} : memref<2x2x2x256xf32, #tpu.memory_space<vmem>>, vector<2x1x2x256xf32>,
    return
  }
  func.func @transform_0(%arg0: i32, %arg1: i32, %arg2: i32) -> (i32, i32, i32) {
    %c0_i32 = arith.constant 0 : i32
    %c0_i32_0 = arith.constant 0 : i32
    %c0_i32_1 = arith.constant 0 : i32
    return %c0_i32, %arg1, %c0_i32_0 : i32, i32, i32
  }
  func.func @transform_1(%arg0: i32, %arg1: i32, %arg2: i32) -> (i32, i32, i32, i32) {
    %c0_i32 = arith.constant 0 : i32
    %c0_i32_0 = arith.constant 0 : i32
    return %arg0, %c0_i32, %arg1, %arg2 : i32, i32, i32, i32
  }
  func.func @transform_2(%arg0: i32, %arg1: i32, %arg2: i32) -> (i32, i32, i32, i32) {
    %c0_i32 = arith.constant 0 : i32
    %c0_i32_0 = arith.constant 0 : i32
    return %arg0, %c0_i32, %arg1, %arg2 : i32, i32, i32, i32
  }
}

</mosaic_0001>

<bundles_post_ra>
// kernel: tpu_custom_call.1
= control target key start
LH: loop header
LB: loop body
LE: loop exit
PB: predicated region body
PF: predicated region fallthrough
CT: control target
= control target key end

     0   :  { %7 = vsyncpa [#allocation3], 0  ;;  %s282_s0 = inlined_call_operand.vmem [shape: f32[4,2,1], index: 0, kind: input, shape index: {}]   ;;  %s283_s1 = inlined_call_operand.hbm [shape: f32[2,2,2,256], index: 1, kind: input, shape index: {}]   ;;  %s284_s2 = inlined_call_operand.hbm [shape: f32[2,2,2,256], index: 2, kind: output, shape index: {}]  }
   0x1   :  { %8 = vsyncpa [#allocation4], 0  ;;  %s236_s9 = smov [#allocation2]  }
   0x2   :  { %s16_s10 = sshll.u32 %s236_s9, 4  ;;  %s17_s10 = int_to_ptr.vmem [resolvable:$true] %s16_s10 }
   0x3   :  { %s200_s11 = scalar_lea.vmem %s17_s10, 256  ;;  %p205_p1 = scmp.lt.s32.totalorder %s17_s10, %s17_s10 }
   0x4   :  { %p201_p0 = scmp.ne.s32.totalorder %s17_s10, %s200_s11  ;;  %p206_p2 = scmp.lt.s32.totalorder %s200_s11, %s200_s11 }
   0x6   :  { %p207_p3 = por %p206_p2, %p205_p1 }
   0x8   :  { %p208_p4 = pnand %p207_p3, %p201_p0 }
   0xa   :  { %211 = shalt.err (!%p208_p4)
}
   0xb   :  { %s237_s12 = smov 64   ;;  %s238_s13 = smov 4  }
   0xc   :  { %22 = dma.hbm_to_vmem [thread:$0]  %s283_s1, 256, %s17_s10, [#allocation3], %s237_s12, %s237_s12, %s238_s13  }
   0xd   :  { %232 = dma.done.wait [#allocation3], 256  }
   0xe   :  { %233 = vsyncadd [#allocation3], 4294967040  ;;  %v239_v0 = vmov 0   ;;  %v26_v1 = vld [vmem:[%s282_s0] sm:$0x3]  ;;  %v45_v7 = vlaneseq }
   0xf   :  { %190 = vset.pattern.permute.xlu0 %v239_v0  ;;  %191 = vset.pattern.permute.xlu1 %v239_v0  ;;  %v181_v2 = vld [vmem:[%s282_s0 + $0x4] sm:$0x3]  ;;  %v180_v3 = vld [vmem:[%s282_s0 + $0x2] sm:$0x3]  ;;  %v182_v4 = vld [vmem:[%s282_s0 + $0x6] sm:$0x3] }
  0x10   :  { %40 = vperm.xlu0 %190, %v26_v1   ;;  %72 = vperm.xlu1 %191, %v181_v2   ;;  %v240_v5 = vmov 269488144   ;;  %v46_v9 = vshrl.u32 %v45_v7, 7  ;;  %v241_v12 = vmov 1983009808   ;;  %s242_s0 = smov [#allocation5]  }
  0x11   :  { %v43_v6 = vunpack.c.l.s4 %v240_v5  ;;  %v78_v13 = vunpack.c.l.s4 %v241_v12  ;;  %v33_v14 = vld [vmem:[#allocation2] sm:$0xf]  ;;  %v34_v16 = vld [vmem:[#allocation2 + $0x8] sm:$0xf]  ;;  %v36_v17 = vld [vmem:[#allocation2 + $0x4] sm:$0xf] }
  0x12   :  { %v37_v18 = vld [vmem:[#allocation2 + $0xc] sm:$0xf]  ;;  %s168_s23 = sshll.u32 %s242_s0, 4  ;;  %s169_s23 = int_to_ptr.vmem [resolvable:$true] %s168_s23 }
  0x13   :  { %v44_v8 = vunpack.c.0.s8 %v43_v6  ;;  %v79_v20 = vunpack.c.0.s8 %v78_v13  ;;  %s212_s24 = scalar_lea.vmem %s169_s23, 256  ;;  %p217_p6 = scmp.lt.s32.totalorder %s169_s23, %s169_s23 }
  0x14   :  { %54 = vperm.xlu0 %190, %v180_v3   ;;  %129 = vperm.xlu1 %191, %v182_v4   ;;  %p213_p5 = scmp.ne.s32.totalorder %s169_s23, %s212_s24  ;;  %p218_p7 = scmp.lt.s32.totalorder %s212_s24, %s212_s24 }
  0x15   :  { %v47_v10 = vsub.s32 %v44_v8, %v46_v9  ;;  %v82_v26 = vsub.s32 %v79_v20, %v46_v9 }
  0x16   :  { %p219_p8 = por %p218_p7, %p217_p6 }
  0x18   :  { %p220_p9 = pnand %p219_p8, %p213_p5 }
  0x8b   :  { %v41_v11 = vpop.permute.xlu0 %40  ;;  %v73_v29 = vpop.permute.xlu1 %72 }
  0x8c   :  { %v48_v15 = vrot.slane %v41_v11, %v47_v10 }
  0x8e   :  { %v50_v22 = vmul.f32 %v48_v15, %v33_v14  ;;  %v51_v23 = vmul.f32 %v48_v15, %v34_v16 }
  0x8f   :  { %v55_v19 = vpop.permute.xlu0 %54  ;;  %v130_v34 = vpop.permute.xlu1 %129 }
  0x90   :  { %v62_v21 = vrot.slane %v55_v19, %v47_v10 }
  0x92   :  { %v64_v24 = vmul.f32 %v62_v21, %v36_v17  ;;  %v65_v25 = vmul.f32 %v62_v21, %v37_v18 }
  0x94   :  { %v66_v27 = vsub.f32 %v50_v22, %v64_v24  ;;  %v67_v28 = vsub.f32 %v51_v23, %v65_v25 }
  0x96   :  { %v68_v30 = vmax.f32 %v66_v27, 0.0  ;;  %v69_v31 = vmax.f32 %v67_v28, 0.0 }
  0x98   :  { %v83_v32 = vrot.slane %v68_v30, %v82_v26  ;;  %v91_v33 = vrot.slane %v69_v31, %v82_v26 }
  0x9a   :  { %v84_v35 = vcombine.high %v83_v32, %v83_v32  ;;  %v92_v36 = vcombine.high %v91_v33, %v91_v33  ;;  %v97_v37 = vmul.f32 %v83_v32, %v73_v29  ;;  %v99_v38 = vmul.f32 %v91_v33, %v73_v29 }
  0x9b   :  { %v132_v39 = vmul.f32 %v130_v34, %v83_v32  ;;  %v134_v40 = vmul.f32 %v130_v34, %v91_v33 }
  0x9c   :  { %v98_v41 = vmul.f32 %v84_v35, %v73_v29  ;;  %v100_v42 = vmul.f32 %v92_v36, %v73_v29  ;;  %v133_v43 = vmul.f32 %v130_v34, %v84_v35  ;;  %v135_v44 = vmul.f32 %v130_v34, %v92_v36 }
  0x9e   :  { %v105_v45 = vcombine.low %v97_v37, %v98_v41  ;;  %v113_v46 = vcombine.low %v99_v38, %v100_v42  ;;  %v140_v47 = vcombine.low %v132_v39, %v133_v43  ;;  %v148_v48 = vcombine.low %v134_v40, %v135_v44 }
  0xa0   :  { %v112_v49 = vrot.slane %v105_v45, %v82_v26  ;;  %v120_v50 = vrot.slane %v113_v46, %v82_v26  ;;  %v147_v51 = vrot.slane %v140_v47, %v82_v26  ;;  %v155_v52 = vrot.slane %v148_v48, %v82_v26 }
  0xa2   :  { %v158_v53 = vadd.f32 %v147_v51, %v36_v17  ;;  %v159_v54 = vadd.f32 %v155_v52, %v37_v18  ;;  %v123_v55 = vsub.f32 %v33_v14, %v112_v49  ;;  %v124_v56 = vsub.f32 %v34_v16, %v120_v50 }
  0xa4   :  { %161 = vst [vmem:[#allocation5 + $0x4] sm:$0xf] %v158_v53  ;;  %162 = vst [vmem:[#allocation5 + $0xc] sm:$0xf] %v159_v54 }
  0xa5   :  { %125 = vst [vmem:[#allocation5] sm:$0xf] %v123_v55  ;;  %126 = vst [vmem:[#allocation5 + $0x8] sm:$0xf] %v124_v56 }
  0xa6   :  { %223 = shalt.err (!%p220_p9)
}
  0xa7   :  { %174 = dma.vmem_to_hbm [thread:$0]  %s169_s23, 256, %s284_s2, [#allocation4], %s237_s12, %s237_s12, %s238_s13  }
  0xa8   :  { %234 = dma.done.wait [#allocation4], 256  }
  0xa9   :  { %235 = vsyncadd [#allocation4], 4294967040 }
  0xaa   :  { %178 = vsyncpa [#allocation3], 1 }
  0xab   :  { %179 = vsyncpa [#allocation4], 1 }

</bundles_post_ra>
